<compile_context>
chip_gen: v5e
topology: v5e:2x2
jax: 0.10.0
libtpu: 0.0.40
codegen_flags: <defaults>
</compile_context>

<pallas_src>
import jax
import jax.numpy as jnp
from jax.experimental import pallas as pl
from jax.experimental.pallas import tpu as pltpu


def logreg_kernel(x_ref, wt_ref, b_ref, o_ref, acc_ref):
    # x_ref: (TB, TK), wt_ref: (TK, O), b_ref: (1, O), o_ref: (TB, O), acc_ref: (TB, O) f32
    k = pl.program_id(1)

    @pl.when(k == 0)
    def _():
        acc_ref[...] = jnp.zeros_like(acc_ref)

    # Canonical MXU orientation: LHS contracts its last dim, RHS its first dim.
    acc_ref[...] += jnp.dot(x_ref[...], wt_ref[...],
                            preferred_element_type=jnp.float32)

    @pl.when(k == pl.num_programs(1) - 1)
    def _():
        logits = acc_ref[...] + b_ref[...]                 # (1, O) broadcast over rows
        o_ref[...] = jax.nn.sigmoid(logits).astype(o_ref.dtype)   # EUP; free vs DMA


def _round_up(n, m):
    return ((n + m - 1) // m) * m


def _block_bytes(sub, lane, n_buffers, itemsize):
    # VMEM footprint of one pipelined block, padded to the (8, 128) vreg tiling.
    return n_buffers * _round_up(sub, 8) * _round_up(lane, 128) * itemsize


def _vmem_need(tb, tk, out_dim, in_itemsize):
    return (_block_bytes(tb, tk, 2, in_itemsize)          # x, double-buffered
            + _block_bytes(tk, out_dim, 2, in_itemsize)   # W^T (conservative: 2 bufs)
            + _block_bytes(1, out_dim, 2, 4)              # bias (f32)
            + _block_bytes(tb, out_dim, 2, 4)             # output block (f32)
            + _block_bytes(tb, out_dim, 1, 4))            # accumulator scratch (f32)


def _select_tiles(B, D, O, vmem_budget, in_itemsize):
    """Pick (TB, TK): biggest roofline-friendly batch tile that fits the VMEM budget."""
    TK_CAP = 4096
    TK = D
    if D > TK_CAP:
        # Only tile K when a multiple-of-128 divisor exists: padding a reduction
        # axis would add garbage into the accumulator.
        for cand in range(TK_CAP, 127, -128):
            if D % cand == 0:
                TK = cand
                break

    if B <= 128:
        return B, TK                     # single full-batch tile (block == full dims)

    best, best_score = None, None
    for tb in (1024, 512, 384, 256, 128):
        if tb <= B and _vmem_need(tb, TK, O, in_itemsize) <= vmem_budget:
            multi = pl.cdiv(B, tb) >= 2              # >= 2 grid steps: v7x megacore
            score = (multi, tb >= 256, B % tb == 0, tb)
            if best_score is None or score > best_score:
                best, best_score = tb, score
    if best is not None:
        return best, TK

    # Huge D with no clean K divisor: shrink TB (stays correct, just off roofline).
    tb = 128
    while tb > 8 and _vmem_need(tb, TK, O, in_itemsize) > vmem_budget:
        tb //= 2
    return max(tb, 8), TK


def logistic_regression(x, weight, bias, *, stream_dtype=None):
    """x: (B, D); weight: (O, D) (PyTorch nn.Linear layout); bias: (O,)."""
    B, D = x.shape
    O = weight.shape[0]

    # One-time W transpose in the wrapper (O*D elements, tiny) so the kernel matmul
    # is in canonical MXU orientation -> no per-step XLU transpose of the x tile.
    w_t = weight.T                                   # (D, O)
    b2d = bias.reshape(1, O).astype(jnp.float32)
    if stream_dtype is not None:                     # e.g. jnp.bfloat16: halves HBM reads
        x = x.astype(stream_dtype)
        w_t = w_t.astype(stream_dtype)
    in_itemsize = x.dtype.itemsize

    # Generation-aware VMEM budget (v5e/v6e: 128 MiB, v7x: 64 MiB per TensorCore).
    try:
        vmem_cap = int(getattr(pltpu.get_tpu_info(), "vmem_capacity_bytes",
                               64 * 1024 * 1024))
    except Exception:
        vmem_cap = 64 * 1024 * 1024                  # conservative v7x per-TC default
    vmem_budget = int(vmem_cap * 0.7)

    TB, TK = _select_tiles(B, D, O, vmem_budget, in_itemsize)
    grid_b = pl.cdiv(B, TB)
    grid_k = pl.cdiv(D, TK)

    need = _vmem_need(TB, TK, O, in_itemsize)
    vmem_limit = min(int(vmem_cap * 0.9), max(2 * need, 16 * 1024 * 1024))

    cost = pl.CostEstimate(
        flops=2 * B * D * O,
        transcendentals=B * O,
        bytes_accessed=in_itemsize * (B * D + D * O) + 4 * (O + B * O),
    )

    out = pl.pallas_call(
        logreg_kernel,
        out_shape=jax.ShapeDtypeStruct((B, O), jnp.float32),
        grid_spec=pltpu.PrefetchScalarGridSpec(
            num_scalar_prefetch=0,
            grid=(grid_b, grid_k),                             # reduction axis last
            in_specs=[
                pl.BlockSpec((TB, TK), lambda i, k: (i, k)),   # x: streamed tiles
                pl.BlockSpec((TK, O), lambda i, k: (k, 0)),    # W^T: batch-resident
                pl.BlockSpec((1, O), lambda i, k: (0, 0)),     # bias: resident
            ],
            out_specs=pl.BlockSpec((TB, O), lambda i, k: (i, 0)),
            scratch_shapes=[pltpu.VMEM((TB, O), jnp.float32)],  # f32 accumulator
        ),
        compiler_params=pltpu.CompilerParams(
            dimension_semantics=("parallel", "arbitrary"),
            vmem_limit_bytes=vmem_limit,
        ),
        cost_estimate=cost,
    )(x, w_t, b2d)

    # torch-style .squeeze(): drop ALL size-1 dims.
    return jnp.squeeze(out)


if __name__ == "__main__":
    key = jax.random.PRNGKey(0)
    k_x, k_w, k_b = jax.random.split(key, 3)

    batch, input_dim, output_dim = 8, 32, 4

    x = jax.random.normal(k_x, (batch, input_dim), dtype=jnp.float32)
    # Deterministic synthetic params (nn.Linear-style uniform init bound)
    bound = 1.0 / jnp.sqrt(input_dim)
    weight = jax.random.uniform(k_w, (output_dim, input_dim),
                                minval=-bound, maxval=bound, dtype=jnp.float32)
    bias = jax.random.uniform(k_b, (output_dim,),
                              minval=-bound, maxval=bound, dtype=jnp.float32)

    y = logistic_regression(x, weight, bias)
    jax.block_until_ready(y)

    # Reference check in plain JAX (same default matmul precision as the kernel).
    y_ref = jnp.squeeze(jax.nn.sigmoid(x @ weight.T + bias))
    assert y.shape == y_ref.shape
    assert jnp.allclose(y, y_ref, atol=1e-5), "mismatch vs reference"

    print("KERNEL_OK")
</pallas_src>

<mosaic_0001>
module attributes {stable_mosaic.version = 11 : i64} {
  func.func @logreg_kernel(%arg0: i32, %arg1: i32, %arg2: memref<8x32xf32, #tpu.memory_space<vmem>>, %arg3: memref<32x4xf32, #tpu.memory_space<vmem>>, %arg4: memref<1x4xf32, #tpu.memory_space<vmem>>, %arg5: memref<8x4xf32, #tpu.memory_space<vmem>>, %arg6: memref<8x4xf32, #tpu.memory_space<vmem>>) attributes {dimension_semantics = [#tpu.dimension_semantics<parallel>, #tpu.dimension_semantics<arbitrary>], iteration_bounds = array<i64: 1, 1>, scalar_prefetch = 0 : i64, scratch_operands = 1 : i64, tpu.core_type = #tpu.core_type<tc>, window_params = [{transform_indices = @transform_0, window_bounds = array<i64: 8, 32>}, {transform_indices = @transform_1, window_bounds = array<i64: 32, 4>}, {pipeline_mode = #tpu.pipeline_mode<synchronous>, transform_indices = @transform_2, window_bounds = array<i64: 1, 4>}, {transform_indices = @transform_3, window_bounds = array<i64: 8, 4>}]} {
    %c0_i32 = arith.constant 0 : i32
    %0 = arith.cmpi eq, %arg1, %c0_i32 : i32
    %1 = arith.extui %0 : i1 to i32
    %c0_i32_0 = arith.constant 0 : i32
    %2 = arith.cmpi ne, %1, %c0_i32_0 : i32
    scf.if %2 {
      %cst_10 = arith.constant 0.000000e+00 : f32
      %12 = vector.broadcast %cst_10 : f32 to vector<8x4xf32>
      %c0_11 = arith.constant 0 : index
      %c0_12 = arith.constant 0 : index
      %13 = vector.load %arg6[%c0_11, %c0_12] : memref<8x4xf32, #tpu.memory_space<vmem>>, vector<8x4xf32>
      tpu.vector_store %arg6[%c0_11, %c0_12], %12 {strides = array<i32>} : memref<8x4xf32, #tpu.memory_space<vmem>>, vector<8x4xf32>,
    } else {
    }
    %c0 = arith.constant 0 : index
    %c0_1 = arith.constant 0 : index
    %3 = vector.load %arg6[%c0, %c0_1] : memref<8x4xf32, #tpu.memory_space<vmem>>, vector<8x4xf32>
    %c0_2 = arith.constant 0 : index
    %c0_3 = arith.constant 0 : index
    %4 = vector.load %arg2[%c0_2, %c0_3] : memref<8x32xf32, #tpu.memory_space<vmem>>, vector<8x32xf32>
    %c0_4 = arith.constant 0 : index
    %c0_5 = arith.constant 0 : index
    %5 = vector.load %arg3[%c0_4, %c0_5] : memref<32x4xf32, #tpu.memory_space<vmem>>, vector<32x4xf32>
    %cst = arith.constant dense<0.000000e+00> : vector<8x4xf32>
    %6 = tpu.matmul %4, %5, %cst {dimension_numbers = #tpu.dot_dimension_numbers<[1], [0], [0], [1], [0, 0, 1, 1], [], []>} : vector<8x32xf32>, vector<32x4xf32>, vector<8x4xf32> -> vector<8x4xf32>
    %7 = arith.addf %3, %6 : vector<8x4xf32>
    %c0_6 = arith.constant 0 : index
    %c0_7 = arith.constant 0 : index
    %8 = vector.load %arg6[%c0_6, %c0_7] : memref<8x4xf32, #tpu.memory_space<vmem>>, vector<8x4xf32>
    tpu.vector_store %arg6[%c0_6, %c0_7], %7 {strides = array<i32>} : memref<8x4xf32, #tpu.memory_space<vmem>>, vector<8x4xf32>,
    %c0_i32_8 = arith.constant 0 : i32
    %9 = arith.cmpi eq, %arg1, %c0_i32_8 : i32
    %10 = arith.extui %9 : i1 to i32
    %c0_i32_9 = arith.constant 0 : i32
    %11 = arith.cmpi ne, %10, %c0_i32_9 : i32
    scf.if %11 {
      %c0_10 = arith.constant 0 : index
      %c0_11 = arith.constant 0 : index
      %12 = vector.load %arg6[%c0_10, %c0_11] : memref<8x4xf32, #tpu.memory_space<vmem>>, vector<8x4xf32>
      %c0_12 = arith.constant 0 : index
      %c0_13 = arith.constant 0 : index
      %13 = vector.load %arg4[%c0_12, %c0_13] : memref<1x4xf32, #tpu.memory_space<vmem>>, vector<1x4xf32>
      %14 = vector.broadcast %13 : vector<1x4xf32> to vector<8x4xf32>
      %15 = arith.addf %12, %14 : vector<8x4xf32>
      %16 = arith.negf %15 : vector<8x4xf32>
      %17 = math.exp %16 : vector<8x4xf32>
      %cst_14 = arith.constant 1.000000e+00 : f32
      %18 = vector.broadcast %cst_14 : f32 to vector<8x4xf32>
      %19 = arith.addf %18, %17 : vector<8x4xf32>
      %20 = arith.divf %18, %19 : vector<8x4xf32>
      %c0_15 = arith.constant 0 : index
      %c0_16 = arith.constant 0 : index
      %21 = vector.load %arg5[%c0_15, %c0_16] : memref<8x4xf32, #tpu.memory_space<vmem>>, vector<8x4xf32>
      tpu.vector_store %arg5[%c0_15, %c0_16], %20 {strides = array<i32>} : memref<8x4xf32, #tpu.memory_space<vmem>>, vector<8x4xf32>,
    } else {
    }
    return
  }
  func.func @transform_0(%arg0: i32, %arg1: i32) -> (i32, i32) {
    %c0_i32 = arith.constant 0 : i32
    return %arg0, %arg1 : i32, i32
  }
  func.func @transform_1(%arg0: i32, %arg1: i32) -> (i32, i32) {
    %c0_i32 = arith.constant 0 : i32
    %c0_i32_0 = arith.constant 0 : i32
    return %arg1, %c0_i32 : i32, i32
  }
  func.func @transform_2(%arg0: i32, %arg1: i32) -> (i32, i32) {
    %c0_i32 = arith.constant 0 : i32
    %c0_i32_0 = arith.constant 0 : i32
    %c0_i32_1 = arith.constant 0 : i32
    return %c0_i32, %c0_i32_0 : i32, i32
  }
  func.func @transform_3(%arg0: i32, %arg1: i32) -> (i32, i32) {
    %c0_i32 = arith.constant 0 : i32
    %c0_i32_0 = arith.constant 0 : i32
    return %arg0, %c0_i32 : i32, i32
  }
}

</mosaic_0001>

<bundles_post_ra>
// kernel: tpu_custom_call.1
= control target key start
LH: loop header
LB: loop body
LE: loop exit
PB: predicated region body
PF: predicated region fallthrough
CT: control target
= control target key end

     0   :  { %vm18_vm0 = vcmask 31744   ;;  %v94_v2 = vmov 0.0   ;;  %vm26_vm1 = vcmask 261120   ;;  %s139_s1 = inlined_call_operand.vmem [shape: f32[32,4], index: 1, kind: input, shape index: {}]   ;;  %s140_s2 = inlined_call_operand.vmem [shape: f32[1,4], index: 2, kind: input, shape index: {}]   ;;  %s141_s0 = inlined_call_operand.vmem [shape: f32[8,32], index: 0, kind: input, shape index: {}]   ;;  %s142_s3 = inlined_call_operand.vmem [shape: f32[8,4], index: 3, kind: output, shape index: {}]  }
   0x1   :  { %v25_v0 = vld [vmem:[%s139_s1 + $0x18] sm:$0xff]  ;;  %v24_v1 = vld [vmem:[%s139_s1 + $0x10] sm:$0xff]  ;;  %19 = vst.msk [vmem:[#allocation2] sm:$0xff] %vm18_vm0, %v94_v2  ;;  %v23_v3 = vld [vmem:[%s139_s1 + $0x8] sm:$0xff] }
   0x2   :  { %42 = vmatpush.msra.mxu0 %v25_v0  ;;  %v22_v4 = vld [vmem:[%s139_s1] sm:$0xff] }
   0x3   :  { %v21_v5 = vld [vmem:[%s141_s0] sm:$0xff] }
   0x4   :  { %43 = vmatpush.msra.mxu0 %v24_v1  ;;  %v89_v9 = vld [vmem:[%s140_s2] ss:$0 sm:$0xff] }
   0x6   :  { %44 = vmatpush.msra.mxu0 %v23_v3 }
   0x8   :  { %45 = vmatpush.msra.mxu0 %v22_v4  ;;  %v20_v6 = vld [vmem:[#allocation2] sm:$0xff] }
   0x9   :  { %86 = vmatmul.msk.f32.vlgmr.msra.gmra.mxu0 %vm26_vm1, %v21_v5 }
  0x86   :  { %v47_v7 = vpop.f32.mrf.mxu0 }
  0x87   :  { %v50_v8 = vadd.f32 %v47_v7, %v20_v6 }
  0x89   :  { %52 = vst.msk [vmem:[#allocation2] sm:$0xff] %vm18_vm0, %v50_v8 }
  0x90   :  { %v56_v10 = vld [vmem:[#allocation2] sm:$0xff] }
  0x91   :  { %v61_v11 = vadd.f32 %v89_v9, %v56_v10 }
  0x93   :  { %v87_v12 = vmul.f32 -1.442695, %v61_v11 }
  0x95   :  { %90 = vpow2.f32 %v87_v12 }
  0x9b   :  { %v91_v13 = vpop.eup %90 }
  0x9c   :  { %v65_v14 = vadd.f32 1.0, %v91_v13 }
  0x9e   :  { %92 = vrcp.f32 %v65_v14  ;;  %v77_v18 = vand.u32 2147483648, %v65_v14  ;;  %v75_v20 = vand.u32 2147483647, %v65_v14  ;;  %vm71_vm3 = vweird.f32 %v65_v14 }
  0xa0   :  { %v78_v22 = vor.u32 1.1754944e-38, %v77_v18  ;;  %vm76_vm5 = vcmp.eq.f32.partialorder %v75_v20, 8.507059e+37 }
  0xa4   :  { %v93_v15 = vpop.eup %92 }
  0xa5   :  { %v67_v16 = vmul.f32 %v93_v15, %v65_v14  ;;  %vm72_vm2 = vweird.f32 %v93_v15 }
  0xa6   :  { %vm73_vm4 = vmor %vm71_vm3, %vm72_vm2 }
  0xa7   :  { %v68_v17 = vsub.f32 1.0, %v67_v16 }
  0xa9   :  { %v69_v19 = vmul.f32 %v93_v15, %v68_v17 }
  0xab   :  { %v70_v21 = vadd.f32 %v93_v15, %v69_v19 }
  0xad   :  { %v74_v23 = vsel %vm73_vm4, %v93_v15, %v70_v21 }
  0xae   :  { %v79_v24 = vsel %vm76_vm5, %v78_v22, %v74_v23 }
  0xaf   :  { %81 = vst.msk [vmem:[%s142_s3] sm:$0xff] %vm18_vm0, %v79_v24 }

</bundles_post_ra>
